<compile_context>
chip_gen: v7x
topology: tpu7x:2x2x1
jax: 0.10.0
libtpu: 0.0.40
codegen_flags: <defaults>
</compile_context>

<pallas_src>
import functools

import jax
import jax.numpy as jnp
from jax.experimental import pallas as pl
from jax.experimental.pallas import tpu as pltpu


def _graph_nonlocal_kernel(x_ref, gof_ref, wth_ref, bth_ref, wpg_ref, bpg_ref,
                           wout_ref, bout_ref, o_ref, *, n_s, mxu_dtype):
    bb, n, c = x_ref.shape                      # batch-block, joints, channels
    ci = wth_ref.shape[1]                       # inter channels (C // 2)

    # MXU operands in `mxu_dtype` (bf16 -> ~2x MXU rate, half the weight DMA);
    # accumulation and all VPU math stay in f32.
    x_mxu = x_ref[...].astype(mxu_dtype).reshape(bb * n, c)

    # theta projection + packed [phi | g] projection.  theta runs as its own
    # dot so the only channel split lands on the tiny pooled tensor below.
    th = (jnp.dot(x_mxu, wth_ref[...], preferred_element_type=jnp.float32)
          + bth_ref[...]).reshape(bb, n, ci)                       # (bb, N, Ci)
    pg = (jnp.dot(x_mxu, wpg_ref[...], preferred_element_type=jnp.float32)
          + bpg_ref[...]).reshape(bb, n, 2 * ci)                   # (bb, N, 2Ci)

    # MaxPool1d(group_size) over the *grouped* joint order, fused with the
    # grouped_order permutation.  Unrolled loop over the n_s groups with a
    # select-mask max: keeps only a (bb, N, 2Ci) temp live (no 4-D broadcast).
    gof = gof_ref[...]                                             # (N, 1) int32
    pooled_rows = []
    for k in range(n_s):                                           # n_s static, small
        member = (gof == k)[None, :, :]                            # (1, N, 1) bool
        pooled_rows.append(
            jnp.max(jnp.where(member, pg, -jnp.inf), axis=1))      # (bb, 2Ci)
    pooled = jnp.stack(pooled_rows, axis=1)                        # (bb, n_s, 2Ci)
    ph_p = pooled[:, :, :ci]                                       # pooled phi
    g_p = pooled[:, :, ci:]                                        # pooled g

    # Embedded-Gaussian attention.  With n_s <= 8 these matmuls are MXU
    # push/drain latency bound; contraction is over the trailing axis of both
    # operands so no large transpose is materialized.  Softmax in f32 with an
    # EXACT reciprocal (the approx one caused the previous correctness miss).
    f = jnp.einsum("bni,bmi->bnm", th.astype(mxu_dtype), ph_p.astype(mxu_dtype),
                   preferred_element_type=jnp.float32)             # (bb, N, n_s)
    f = f - jnp.max(f, axis=-1, keepdims=True)
    e = jnp.exp(f)
    f_div = e / jnp.sum(e, axis=-1, keepdims=True)
    y = jnp.einsum("bnm,bmi->bni", f_div.astype(mxu_dtype), g_p.astype(mxu_dtype),
                   preferred_element_type=jnp.float32)             # (bb, N, Ci)

    # Output conv with eval-mode BatchNorm folded in, plus residual.  The
    # residual re-reads x_ref here instead of keeping an f32 copy of x live
    # for the entire body (halves the largest activation's VMEM footprint).
    wy = (jnp.dot(y.reshape(bb * n, ci).astype(mxu_dtype), wout_ref[...],
                  preferred_element_type=jnp.float32) + bout_ref[...])
    o_ref[...] = (wy.reshape(bb, n, c)
                  + x_ref[...].astype(jnp.float32)).astype(o_ref.dtype)


def _auto_batch_tiles(B, N, C, Ci, x_itemsize, vmem_budget_bytes=24 << 20):
    """VMEM-driven batch tiling.

    Policy (per the perf review): prefer >=2 grid steps when B allows (so the
    x fetch / output writeback pipeline under compute and v7x megacore gets
    work on both TensorCores), then grow the step count until the per-step
    block fits a v7x-safe budget (64 MiB physical VMEM, 32 MiB scoped default).
    """
    def per_step_bytes(bb):
        xo = 2 * 2 * bb * N * C * x_itemsize          # x + out blocks, double-buffered
        act = 4 * bb * N * (3 * Ci + Ci + C)          # proj, y, wy held in f32
        return xo + act

    bt = 1 if B == 1 else 2
    while bt < B and (B % bt != 0 or per_step_bytes(B // bt) > vmem_budget_bytes):
        bt += 1
    return bt


def graph_nonlocal(x, params, grouped_order, restored_order, group_size,
                   eps=1e-5, mxu_dtype=jnp.bfloat16, batch_tiles=None):
    """Forward pass of _GraphNonLocal (eval-mode BatchNorm folded in).

    mxu_dtype:   dtype of the MXU operands (weights + activation casts);
                 bf16 for production, f32 for bit-accurate checks.
    batch_tiles: number of grid steps over the batch axis; None -> VMEM-aware
                 auto choice.  Must divide B when given explicitly.
    """
    B, N, C = x.shape
    Ci = params["w_g"].shape[1]
    if N % group_size != 0:
        raise ValueError("MaxPool1d requires N % group_size == 0")
    n_s = N // group_size

    # --- one-time parameter packing in the wrapper (negligible XLA work) ----
    w_th = params["w_theta"].astype(mxu_dtype)                         # (C, Ci)
    w_pg = jnp.concatenate([params["w_phi"], params["w_g"]],
                           axis=1).astype(mxu_dtype)                   # (C, 2Ci)
    b_th = params["b_theta"].astype(jnp.float32)                       # (1, Ci)
    b_pg = jnp.concatenate([params["b_phi"], params["b_g"]],
                           axis=1).astype(jnp.float32)                 # (1, 2Ci)
    # Fold eval-mode BatchNorm into the W conv.
    # TODO(synk): training-mode BatchNorm (batch statistics) is not supported.
    scale = params["bn_gamma"] * jax.lax.rsqrt(params["bn_var"] + eps)  # (1, C)
    w_out = (params["w_w"] * scale).astype(mxu_dtype)                   # (Ci, C)
    b_out = ((params["b_w"] - params["bn_mean"]) * scale
             + params["bn_beta"]).astype(jnp.float32)                   # (1, C)
    # Pooling-group table (fuses grouped_order into the kernel): joint
    # n = grouped_order[j] belongs to group j // group_size.  Requires each
    # group to have exactly group_size members (true when grouped_order is a
    # permutation, as SemGCN constructs it).
    group_of = jnp.zeros((N,), jnp.int32).at[grouped_order].set(
        jnp.arange(N, dtype=jnp.int32) // group_size).reshape(N, 1)

    # Every op except the pool is permutation-equivariant over joints, so the
    # kernel works in original joint order; restored_order (the inverse of
    # grouped_order) is therefore fused away — no restore gather needed.
    del restored_order

    if batch_tiles is None:
        bt = _auto_batch_tiles(B, N, C, Ci, x.dtype.itemsize)
    else:
        if batch_tiles < 1 or B % batch_tiles != 0:
            raise ValueError(f"batch_tiles={batch_tiles} must divide B={B}")
        bt = batch_tiles
    bb = B // bt

    # Cost hint so XLA can overlap/schedule this custom call inside a model.
    mxu_bytes = jnp.dtype(mxu_dtype).itemsize
    flops = (2 * B * N * C * 3 * Ci        # theta + [phi|g] projections
             + 4 * B * N * n_s * Ci        # attention scores + apply
             + 2 * B * N * Ci * C)         # output conv
    param_bytes = ((w_th.size + w_pg.size + w_out.size) * mxu_bytes
                   + (b_th.size + b_pg.size + b_out.size) * 4
                   + group_of.size * 4)
    cost = pl.CostEstimate(
        flops=flops,
        transcendentals=B * N * n_s,
        bytes_accessed=2 * B * N * C * x.dtype.itemsize + bt * param_bytes)

    # NOTE: at production C, the loop-invariant parameter BlockSpecs below
    # should carry pipeline_mode=pl.Buffered(1) (their index_map never
    # changes, so the second pipeline buffer is wasted VMEM).  Omitted at
    # these toy sizes where the saving is a few KiB.
    kernel = functools.partial(_graph_nonlocal_kernel,
                               n_s=n_s, mxu_dtype=mxu_dtype)
    out = pl.pallas_call(
        kernel,
        out_shape=jax.ShapeDtypeStruct((B, N, C), x.dtype),
        grid=(bt,),
        in_specs=[
            pl.BlockSpec((bb, N, C), lambda i: (i, 0, 0)),   # x (batch block)
            pl.BlockSpec((N, 1), lambda i: (0, 0)),          # pooling group table
            pl.BlockSpec((C, Ci), lambda i: (0, 0)),         # theta W
            pl.BlockSpec((1, Ci), lambda i: (0, 0)),         # theta b
            pl.BlockSpec((C, 2 * Ci), lambda i: (0, 0)),     # packed [phi|g] W
            pl.BlockSpec((1, 2 * Ci), lambda i: (0, 0)),     # packed [phi|g] b
            pl.BlockSpec((Ci, C), lambda i: (0, 0)),         # W conv (BN folded)
            pl.BlockSpec((1, C), lambda i: (0, 0)),          # bias (BN folded)
        ],
        out_specs=pl.BlockSpec((bb, N, C), lambda i: (i, 0, 0)),
        compiler_params=pltpu.CompilerParams(
            dimension_semantics=("parallel",)),
        cost_estimate=cost,
    )(x, group_of, w_th, b_th, w_pg, b_pg, w_out, b_out)

    return out  # already in original joint order — no restore gather needed


def reference(x, params, grouped_order, restored_order, group_size, eps=1e-5):
    """Pure-JAX reference with the original module's semantics (f32)."""
    B, N, C = x.shape
    Ci = params["w_g"].shape[1]
    n_s = N // group_size
    xg = x[:, grouped_order, :]

    def conv(v, w, b):
        return jnp.einsum("bnc,ci->bni", v, w) + b

    g = conv(xg, params["w_g"], params["b_g"])
    th = conv(xg, params["w_theta"], params["b_theta"])
    ph = conv(xg, params["w_phi"], params["b_phi"])

    def pool(v):
        return v.reshape(B, n_s, group_size, Ci).max(axis=2)

    g_p, ph_p = pool(g), pool(ph)
    f = jnp.einsum("bni,bmi->bnm", th, ph_p)
    f = jax.nn.softmax(f, axis=-1)
    y = jnp.einsum("bnm,bmi->bni", f, g_p)
    wy = jnp.einsum("bni,ic->bnc", y, params["w_w"]) + params["b_w"]
    wy = (wy - params["bn_mean"]) / jnp.sqrt(params["bn_var"] + eps) \
        * params["bn_gamma"] + params["bn_beta"]
    z = wy + xg
    return z[:, restored_order, :]


if __name__ == "__main__":
    B, N, C = 2, 16, 32          # batch, joints, hid_dim
    group_size = 4               # sub_sample
    Ci = C // 2                  # inter_channels

    key = jax.random.PRNGKey(0)
    keys = jax.random.split(key, 16)

    x = jax.random.normal(keys[0], (B, N, C), dtype=jnp.float32)

    grouped_order = jax.random.permutation(keys[1], N)
    restored_order = jnp.argsort(grouped_order)

    # Deterministic synthetic parameters (not a checkpoint).
    # NOTE: the original module zero-inits the BN affine params; nonzero values
    # are used here so the non-local branch actually contributes in this test.
    params = {
        "w_g":      0.1 * jax.random.normal(keys[2], (C, Ci), jnp.float32),
        "b_g":      0.1 * jax.random.normal(keys[3], (1, Ci), jnp.float32),
        "w_theta":  0.1 * jax.random.normal(keys[4], (C, Ci), jnp.float32),
        "b_theta":  0.1 * jax.random.normal(keys[5], (1, Ci), jnp.float32),
        "w_phi":    0.1 * jax.random.normal(keys[6], (C, Ci), jnp.float32),
        "b_phi":    0.1 * jax.random.normal(keys[7], (1, Ci), jnp.float32),
        "w_w":      0.1 * jax.random.normal(keys[8], (Ci, C), jnp.float32),
        "b_w":      0.1 * jax.random.normal(keys[9], (1, C), jnp.float32),
        "bn_gamma": 1.0 + 0.1 * jax.random.normal(keys[10], (1, C), jnp.float32),
        "bn_beta":  0.1 * jax.random.normal(keys[11], (1, C), jnp.float32),
        "bn_mean":  0.1 * jax.random.normal(keys[12], (1, C), jnp.float32),
        "bn_var":   jax.random.uniform(keys[13], (1, C), jnp.float32, 0.5, 1.5),
    }

    ref = reference(x, params, grouped_order, restored_order, group_size)

    # 1) f32 MXU path, single grid step: bit-accurate module semantics
    #    (exact softmax reciprocal) — tight tolerance.
    out_f32 = graph_nonlocal(x, params, grouped_order, restored_order,
                             group_size, mxu_dtype=jnp.float32, batch_tiles=1)
    out_f32 = jax.block_until_ready(out_f32)
    assert out_f32.shape == (B, N, C)
    assert jnp.allclose(out_f32, ref, atol=1e-4, rtol=1e-4), \
        f"f32 path max abs err = {jnp.max(jnp.abs(out_f32 - ref))}"

    # 2) Production path: bf16 MXU operands, VMEM-aware auto batch tiling
    #    (2 grid steps here -> one per TensorCore on v7x, pipelined DMA on
    #    v5e/v6e).  bf16 operand rounding perturbs the non-local branch at the
    #    ~1e-2 absolute level for these magnitudes, hence the looser tolerance;
    #    the f32 check above pins down the kernel's exact semantics.
    out_bf16 = graph_nonlocal(x, params, grouped_order, restored_order,
                              group_size)   # mxu_dtype=bf16, batch_tiles auto
    out_bf16 = jax.block_until_ready(out_bf16)
    assert out_bf16.shape == (B, N, C)
    assert jnp.allclose(out_bf16, ref, atol=8e-2, rtol=8e-2), \
        f"bf16 path max abs err = {jnp.max(jnp.abs(out_bf16 - ref))}"

    print("KERNEL_OK")
</pallas_src>

<mosaic_0001>
module attributes {stable_mosaic.version = 11 : i64} {
  func.func @_graph_nonlocal_kernel(%arg0: i32, %arg1: memref<2x16x32xf32, #tpu.memory_space<vmem>>, %arg2: memref<16x1xi32, #tpu.memory_space<vmem>>, %arg3: memref<32x16xf32, #tpu.memory_space<vmem>>, %arg4: memref<1x16xf32, #tpu.memory_space<vmem>>, %arg5: memref<32x32xf32, #tpu.memory_space<vmem>>, %arg6: memref<1x32xf32, #tpu.memory_space<vmem>>, %arg7: memref<16x32xf32, #tpu.memory_space<vmem>>, %arg8: memref<1x32xf32, #tpu.memory_space<vmem>>, %arg9: memref<2x16x32xf32, #tpu.memory_space<vmem>>) attributes {dimension_semantics = [#tpu.dimension_semantics<parallel>], iteration_bounds = array<i64: 1>, scalar_prefetch = 0 : i64, scratch_operands = 0 : i64, tpu.core_type = #tpu.core_type<tc>, window_params = [{transform_indices = @transform_0, window_bounds = array<i64: 2, 16, 32>}, {pipeline_mode = #tpu.pipeline_mode<synchronous>, transform_indices = @transform_1, window_bounds = array<i64: 16, 1>}, {pipeline_mode = #tpu.pipeline_mode<synchronous>, transform_indices = @transform_2, window_bounds = array<i64: 32, 16>}, {pipeline_mode = #tpu.pipeline_mode<synchronous>, transform_indices = @transform_3, window_bounds = array<i64: 1, 16>}, {pipeline_mode = #tpu.pipeline_mode<synchronous>, transform_indices = @transform_4, window_bounds = array<i64: 32, 32>}, {pipeline_mode = #tpu.pipeline_mode<synchronous>, transform_indices = @transform_5, window_bounds = array<i64: 1, 32>}, {pipeline_mode = #tpu.pipeline_mode<synchronous>, transform_indices = @transform_6, window_bounds = array<i64: 16, 32>}, {pipeline_mode = #tpu.pipeline_mode<synchronous>, transform_indices = @transform_7, window_bounds = array<i64: 1, 32>}, {transform_indices = @transform_8, window_bounds = array<i64: 2, 16, 32>}]} {
    %c0 = arith.constant 0 : index
    %c0_0 = arith.constant 0 : index
    %c0_1 = arith.constant 0 : index
    %0 = vector.load %arg1[%c0, %c0_0, %c0_1] : memref<2x16x32xf32, #tpu.memory_space<vmem>>, vector<2x16x32xf32>
    %1 = vector.shape_cast %0 : vector<2x16x32xf32> to vector<32x32xf32>
    %c0_2 = arith.constant 0 : index
    %c0_3 = arith.constant 0 : index
    %2 = vector.load %arg3[%c0_2, %c0_3] : memref<32x16xf32, #tpu.memory_space<vmem>>, vector<32x16xf32>
    %cst = arith.constant dense<0.000000e+00> : vector<32x16xf32>
    %3 = tpu.matmul %1, %2, %cst {dimension_numbers = #tpu.dot_dimension_numbers<[1], [0], [0], [1], [0, 0, 1, 1], [], []>} : vector<32x32xf32>, vector<32x16xf32>, vector<32x16xf32> -> vector<32x16xf32>
    %c0_4 = arith.constant 0 : index
    %c0_5 = arith.constant 0 : index
    %4 = vector.load %arg4[%c0_4, %c0_5] : memref<1x16xf32, #tpu.memory_space<vmem>>, vector<1x16xf32>
    %5 = vector.broadcast %4 : vector<1x16xf32> to vector<32x16xf32>
    %6 = arith.addf %3, %5 : vector<32x16xf32>
    %7 = vector.shape_cast %6 : vector<32x16xf32> to vector<2x16x16xf32>
    %c0_6 = arith.constant 0 : index
    %c0_7 = arith.constant 0 : index
    %8 = vector.load %arg5[%c0_6, %c0_7] : memref<32x32xf32, #tpu.memory_space<vmem>>, vector<32x32xf32>
    %cst_8 = arith.constant dense<0.000000e+00> : vector<32x32xf32>
    %9 = tpu.matmul %1, %8, %cst_8 {dimension_numbers = #tpu.dot_dimension_numbers<[1], [0], [0], [1], [0, 0, 1, 1], [], []>} : vector<32x32xf32>, vector<32x32xf32>, vector<32x32xf32> -> vector<32x32xf32>
    %c0_9 = arith.constant 0 : index
    %c0_10 = arith.constant 0 : index
    %10 = vector.load %arg6[%c0_9, %c0_10] : memref<1x32xf32, #tpu.memory_space<vmem>>, vector<1x32xf32>
    %11 = vector.broadcast %10 : vector<1x32xf32> to vector<32x32xf32>
    %12 = arith.addf %9, %11 : vector<32x32xf32>
    %13 = vector.shape_cast %12 : vector<32x32xf32> to vector<2x16x32xf32>
    %c0_11 = arith.constant 0 : index
    %c0_12 = arith.constant 0 : index
    %14 = vector.load %arg2[%c0_11, %c0_12] : memref<16x1xi32, #tpu.memory_space<vmem>>, vector<16x1xi32>
    %c0_i32 = arith.constant 0 : i32
    %15 = vector.broadcast %c0_i32 : i32 to vector<16x1xi32>
    %16 = arith.cmpi eq, %14, %15 : vector<16x1xi32>
    %17 = vector.shape_cast %16 : vector<16x1xi1> to vector<1x16x1xi1>
    %cst_13 = arith.constant 0xFF800000 : f32
    %18 = vector.shape_cast %17 : vector<1x16x1xi1> to vector<1x16x1xi1>
    %19 = vector.broadcast %18 : vector<1x16x1xi1> to vector<2x16x32xi1>
    %20 = vector.broadcast %cst_13 : f32 to vector<2x16x32xf32>
    %21 = arith.select %19, %13, %20 : vector<2x16x32xi1>, vector<2x16x32xf32>
    %cst_14 = arith.constant dense<0xFF800000> : vector<2x32xf32>
    %22 = vector.multi_reduction <maximumf>, %21, %cst_14 [1] : vector<2x16x32xf32> to vector<2x32xf32>
    %c1_i32 = arith.constant 1 : i32
    %23 = vector.broadcast %c1_i32 : i32 to vector<16x1xi32>
    %24 = arith.cmpi eq, %14, %23 : vector<16x1xi32>
    %25 = vector.shape_cast %24 : vector<16x1xi1> to vector<1x16x1xi1>
    %cst_15 = arith.constant 0xFF800000 : f32
    %26 = vector.shape_cast %25 : vector<1x16x1xi1> to vector<1x16x1xi1>
    %27 = vector.broadcast %26 : vector<1x16x1xi1> to vector<2x16x32xi1>
    %28 = vector.broadcast %cst_15 : f32 to vector<2x16x32xf32>
    %29 = arith.select %27, %13, %28 : vector<2x16x32xi1>, vector<2x16x32xf32>
    %cst_16 = arith.constant dense<0xFF800000> : vector<2x32xf32>
    %30 = vector.multi_reduction <maximumf>, %29, %cst_16 [1] : vector<2x16x32xf32> to vector<2x32xf32>
    %c2_i32 = arith.constant 2 : i32
    %31 = vector.broadcast %c2_i32 : i32 to vector<16x1xi32>
    %32 = arith.cmpi eq, %14, %31 : vector<16x1xi32>
    %33 = vector.shape_cast %32 : vector<16x1xi1> to vector<1x16x1xi1>
    %cst_17 = arith.constant 0xFF800000 : f32
    %34 = vector.shape_cast %33 : vector<1x16x1xi1> to vector<1x16x1xi1>
    %35 = vector.broadcast %34 : vector<1x16x1xi1> to vector<2x16x32xi1>
    %36 = vector.broadcast %cst_17 : f32 to vector<2x16x32xf32>
    %37 = arith.select %35, %13, %36 : vector<2x16x32xi1>, vector<2x16x32xf32>
    %cst_18 = arith.constant dense<0xFF800000> : vector<2x32xf32>
    %38 = vector.multi_reduction <maximumf>, %37, %cst_18 [1] : vector<2x16x32xf32> to vector<2x32xf32>
    %c3_i32 = arith.constant 3 : i32
    %39 = vector.broadcast %c3_i32 : i32 to vector<16x1xi32>
    %40 = arith.cmpi eq, %14, %39 : vector<16x1xi32>
    %41 = vector.shape_cast %40 : vector<16x1xi1> to vector<1x16x1xi1>
    %cst_19 = arith.constant 0xFF800000 : f32
    %42 = vector.shape_cast %41 : vector<1x16x1xi1> to vector<1x16x1xi1>
    %43 = vector.broadcast %42 : vector<1x16x1xi1> to vector<2x16x32xi1>
    %44 = vector.broadcast %cst_19 : f32 to vector<2x16x32xf32>
    %45 = arith.select %43, %13, %44 : vector<2x16x32xi1>, vector<2x16x32xf32>
    %cst_20 = arith.constant dense<0xFF800000> : vector<2x32xf32>
    %46 = vector.multi_reduction <maximumf>, %45, %cst_20 [1] : vector<2x16x32xf32> to vector<2x32xf32>
    %47 = vector.shape_cast %22 : vector<2x32xf32> to vector<2x1x32xf32>
    %48 = vector.shape_cast %30 : vector<2x32xf32> to vector<2x1x32xf32>
    %49 = vector.shape_cast %38 : vector<2x32xf32> to vector<2x1x32xf32>
    %50 = vector.shape_cast %46 : vector<2x32xf32> to vector<2x1x32xf32>
    %51 = tpu.concatenate %47, %48, %49, %50 in 1 : vector<2x1x32xf32>, vector<2x1x32xf32>, vector<2x1x32xf32>, vector<2x1x32xf32> -> vector<2x4x32xf32>
    %52 = vector.extract_strided_slice %51 {offsets = [0, 0, 0], sizes = [2, 4, 16], strides = [1, 1, 1]} : vector<2x4x32xf32> to vector<2x4x16xf32>
    %53 = vector.extract_strided_slice %51 {offsets = [0, 0, 16], sizes = [2, 4, 16], strides = [1, 1, 1]} : vector<2x4x32xf32> to vector<2x4x16xf32>
    "tpu.trace_start"() <{level = 10 : i32, message = "bni,bmi->bnm"}> : () -> ()
    %cst_21 = arith.constant dense<0.000000e+00> : vector<2x16x4xf32>
    %54 = tpu.matmul %7, %52, %cst_21 {dimension_numbers = #tpu.dot_dimension_numbers<[2], [2], [1], [1], [0, 0, 0, 1, 1, 1], [0], [0]>} : vector<2x16x16xf32>, vector<2x4x16xf32>, vector<2x16x4xf32> -> vector<2x16x4xf32>
    "tpu.trace_stop"() : () -> ()
    %cst_22 = arith.constant dense<0xFF800000> : vector<2x16xf32>
    %55 = vector.multi_reduction <maximumf>, %54, %cst_22 [2] : vector<2x16x4xf32> to vector<2x16xf32>
    %56 = vector.shape_cast %55 : vector<2x16xf32> to vector<2x16x1xf32>
    %57 = vector.broadcast %56 : vector<2x16x1xf32> to vector<2x16x4xf32>
    %58 = arith.subf %54, %57 : vector<2x16x4xf32>
    %59 = math.exp %58 : vector<2x16x4xf32>
    %cst_23 = arith.constant dense<0.000000e+00> : vector<2x16xf32>
    %60 = vector.multi_reduction <add>, %59, %cst_23 [2] : vector<2x16x4xf32> to vector<2x16xf32>
    %61 = vector.shape_cast %60 : vector<2x16xf32> to vector<2x16x1xf32>
    %62 = vector.broadcast %61 : vector<2x16x1xf32> to vector<2x16x4xf32>
    %63 = arith.divf %59, %62 : vector<2x16x4xf32>
    "tpu.trace_start"() <{level = 10 : i32, message = "bnm,bmi->bni"}> : () -> ()
    %cst_24 = arith.constant dense<0.000000e+00> : vector<2x16x16xf32>
    %64 = tpu.matmul %63, %53, %cst_24 {dimension_numbers = #tpu.dot_dimension_numbers<[2], [1], [1], [2], [0, 0, 0, 1, 1, 2], [0], [0]>} : vector<2x16x4xf32>, vector<2x4x16xf32>, vector<2x16x16xf32> -> vector<2x16x16xf32>
    "tpu.trace_stop"() : () -> ()
    %65 = vector.shape_cast %64 : vector<2x16x16xf32> to vector<32x16xf32>
    %c0_25 = arith.constant 0 : index
    %c0_26 = arith.constant 0 : index
    %66 = vector.load %arg7[%c0_25, %c0_26] : memref<16x32xf32, #tpu.memory_space<vmem>>, vector<16x32xf32>
    %cst_27 = arith.constant dense<0.000000e+00> : vector<32x32xf32>
    %67 = tpu.matmul %65, %66, %cst_27 {dimension_numbers = #tpu.dot_dimension_numbers<[1], [0], [0], [1], [0, 0, 1, 1], [], []>} : vector<32x16xf32>, vector<16x32xf32>, vector<32x32xf32> -> vector<32x32xf32>
    %c0_28 = arith.constant 0 : index
    %c0_29 = arith.constant 0 : index
    %68 = vector.load %arg8[%c0_28, %c0_29] : memref<1x32xf32, #tpu.memory_space<vmem>>, vector<1x32xf32>
    %69 = vector.broadcast %68 : vector<1x32xf32> to vector<32x32xf32>
    %70 = arith.addf %67, %69 : vector<32x32xf32>
    %71 = vector.shape_cast %70 : vector<32x32xf32> to vector<2x16x32xf32>
    %c0_30 = arith.constant 0 : index
    %c0_31 = arith.constant 0 : index
    %c0_32 = arith.constant 0 : index
    %72 = vector.load %arg1[%c0_30, %c0_31, %c0_32] : memref<2x16x32xf32, #tpu.memory_space<vmem>>, vector<2x16x32xf32>
    %73 = arith.addf %71, %72 : vector<2x16x32xf32>
    %c0_33 = arith.constant 0 : index
    %c0_34 = arith.constant 0 : index
    %c0_35 = arith.constant 0 : index
    %74 = vector.load %arg9[%c0_33, %c0_34, %c0_35] : memref<2x16x32xf32, #tpu.memory_space<vmem>>, vector<2x16x32xf32>
    tpu.vector_store %arg9[%c0_33, %c0_34, %c0_35], %73 {strides = array<i32>} : memref<2x16x32xf32, #tpu.memory_space<vmem>>, vector<2x16x32xf32>,
    return
  }
  func.func @transform_0(%arg0: i32) -> (i32, i32, i32) {
    %c0_i32 = arith.constant 0 : i32
    %c0_i32_0 = arith.constant 0 : i32
    %c0_i32_1 = arith.constant 0 : i32
    return %arg0, %c0_i32, %c0_i32_0 : i32, i32, i32
  }
  func.func @transform_1(%arg0: i32) -> (i32, i32) {
    %c0_i32 = arith.constant 0 : i32
    %c0_i32_0 = arith.constant 0 : i32
    %c0_i32_1 = arith.constant 0 : i32
    return %c0_i32, %c0_i32_0 : i32, i32
  }
  func.func @transform_2(%arg0: i32) -> (i32, i32) {
    %c0_i32 = arith.constant 0 : i32
    %c0_i32_0 = arith.constant 0 : i32
    %c0_i32_1 = arith.constant 0 : i32
    return %c0_i32, %c0_i32_0 : i32, i32
  }
  func.func @transform_3(%arg0: i32) -> (i32, i32) {
    %c0_i32 = arith.constant 0 : i32
    %c0_i32_0 = arith.constant 0 : i32
    %c0_i32_1 = arith.constant 0 : i32
    return %c0_i32, %c0_i32_0 : i32, i32
  }
  func.func @transform_4(%arg0: i32) -> (i32, i32) {
    %c0_i32 = arith.constant 0 : i32
    %c0_i32_0 = arith.constant 0 : i32
    %c0_i32_1 = arith.constant 0 : i32
    return %c0_i32, %c0_i32_0 : i32, i32
  }
  func.func @transform_5(%arg0: i32) -> (i32, i32) {
    %c0_i32 = arith.constant 0 : i32
    %c0_i32_0 = arith.constant 0 : i32
    %c0_i32_1 = arith.constant 0 : i32
    return %c0_i32, %c0_i32_0 : i32, i32
  }
  func.func @transform_6(%arg0: i32) -> (i32, i32) {
    %c0_i32 = arith.constant 0 : i32
    %c0_i32_0 = arith.constant 0 : i32
    %c0_i32_1 = arith.constant 0 : i32
    return %c0_i32, %c0_i32_0 : i32, i32
  }
  func.func @transform_7(%arg0: i32) -> (i32, i32) {
    %c0_i32 = arith.constant 0 : i32
    %c0_i32_0 = arith.constant 0 : i32
    %c0_i32_1 = arith.constant 0 : i32
    return %c0_i32, %c0_i32_0 : i32, i32
  }
  func.func @transform_8(%arg0: i32) -> (i32, i32, i32) {
    %c0_i32 = arith.constant 0 : i32
    %c0_i32_0 = arith.constant 0 : i32
    %c0_i32_1 = arith.constant 0 : i32
    return %arg0, %c0_i32, %c0_i32_0 : i32, i32, i32
  }
}

</mosaic_0001>

<bundles_post_ra>
// kernel: tpu_custom_call.1
= control target key start
LH: loop header
LB: loop body
LE: loop exit
PB: predicated region body
PF: predicated region fallthrough
CT: control target
= control target key end

     0   :  { %13 = vsyncpa [#allocation3], 0  ;;  %s1387_s0 = inlined_call_operand.vmem [shape: f32[2,16,32], index: 0, kind: input, shape index: {}]   ;;  %s1388_s1 = inlined_call_operand.vmem [shape: s32[16,1], index: 1, kind: input, shape index: {}]   ;;  %s1389_s2 = inlined_call_operand.vmem [shape: f32[32,16], index: 2, kind: input, shape index: {}]   ;;  %s1390_s3 = inlined_call_operand.hbm [shape: f32[1,16], index: 3, kind: input, shape index: {}]   ;;  %s1391_s4 = inlined_call_operand.vmem [shape: f32[32,32], index: 4, kind: input, shape index: {}]   ;;  %s1392_s5 = inlined_call_operand.vmem [shape: f32[1,32], index: 5, kind: input, shape index: {}]   ;;  %s1393_s6 = inlined_call_operand.vmem [shape: f32[16,32], index: 6, kind: input, shape index: {}]   ;;  %s1394_s7 = inlined_call_operand.vmem [shape: f32[1,32], index: 7, kind: input, shape index: {}]   ;;  %s1395_s8 = inlined_call_operand.hbm [shape: f32[2,16,32], index: 8, kind: output, shape index: {}]  }
   0x1   :  { %14 = vsyncpa [#allocation4], 0  ;;  %s1129_s27 = smov [#allocation2]   ;;  %s1081_s9 = scalar_lea.hbm %s1390_s3, 16 }
   0x2   :  { %s27_s28 = sshll.u32 %s1129_s27, 4  ;;  %p1082_p0 = scmp.ne.s32.totalorder %s1390_s3, %s1081_s9  ;;  %s28_s28 = int_to_ptr.vmem [resolvable:$true] %s27_s28 }
   0x3   :  { %p1085_p1 = scmp.lt.u32.totalorder %s1081_s9, %s1390_s3 }
   0x5   :  { %p1087_p2 = pnand %p1085_p1, %p1082_p0 }
   0x7   :  { %1090 = shalt.err (!%p1087_p2)
}
   0x8   :  { %s1091_s14 = scalar_lea.vmem %s28_s28, 16  ;;  %s1095_s15 = scalar_lea.vmem %s28_s28, 32 }
   0x9   :  { %p1092_p3 = scmp.ne.s32.totalorder %s28_s28, %s1091_s14  ;;  %p1096_p4 = scmp.lt.s32.totalorder %s28_s28, %s28_s28 }
   0xa   :  { %p1097_p5 = scmp.lt.s32.totalorder %s1095_s15, %s1091_s14 }
   0xc   :  { %p1098_p6 = por %p1097_p5, %p1096_p4 }
   0xe   :  { %p1099_p7 = pnand %p1098_p6, %p1092_p3 }
  0x10   :  { %1102 = shalt.err (!%p1099_p7)
}
  0x11   :  { %30 = dma.hbm_to_vmem [thread:$0]  %s1390_s3, 16, %s28_s28, [#allocation3]  }
  0x12   :  { %1125 = dma.done.wait [#allocation3], 16  }
  0x13   :  { %1126 = vsyncadd [#allocation3], 4294967280  ;;  %v1130_v0 = vmov 0   ;;  %vm57_vm0 = vcmask 261120   ;;  %v155_v1 = vld [vmem:[%s1391_s4] sm:$0xff]  ;;  %v156_v2 = vld [vmem:[%s1391_s4 + $0x8] sm:$0xff] }
  0x14   :  { %1064 = vset.pattern.permute.xlu1 %v1130_v0  ;;  %1063 = vset.pattern.permute.xlu0 %v1130_v0  ;;  %v157_v3 = vld [vmem:[%s1391_s4 + $0x10] sm:$0xff]  ;;  %v1045_v4 = vpack.c.bf16 %v156_v2, %v155_v1  ;;  %v158_v5 = vld [vmem:[%s1391_s4 + $0x18] sm:$0xff]  ;;  %v1207_v6 = vld [vmem:[%s1387_s0] sm:$0xff]  ;;  %s1132_s25 = smov [#allocation5]  }
  0x15   :  { %v1049_v7 = vpack.c.bf16 %v158_v5, %v157_v3  ;;  %1001 = vmatprep.mubr.msk.f32.mxu1 %vm57_vm0, %v1207_v6  ;;  %v46_v8 = vld [vmem:[%s1389_s2] sm:$0xff]  ;;  %987 = vmatprep.mubr.msk.f32.mxu0 %vm57_vm0, %v1207_v6  ;;  %v47_v9 = vld [vmem:[%s1389_s2 + $0x8] sm:$0xff]  ;;  %v48_v10 = vld [vmem:[%s1389_s2 + $0x10] sm:$0xff]  ;;  %s906_s26 = sshll.u32 %s1132_s25, 4  ;;  %s907_s26 = int_to_ptr.vmem [resolvable:$true] %s906_s26 }
  0x16   :  { %1046 = vmatprep.subr.bf16.mxu1 %v1045_v4  ;;  %v49_v11 = vld [vmem:[%s1389_s2 + $0x18] sm:$0xff]  ;;  %v1037_v12 = vpack.c.bf16 %v47_v9, %v46_v8  ;;  %v251_v14 = vld [vmem:[%s1388_s1] sm:$0xff]  ;;  %v252_v15 = vld [vmem:[%s1388_s1 + $0x8] sm:$0xff]  ;;  %p1108_p9 = scmp.lt.s32.totalorder %s907_s26, %s907_s26 }
  0x17   :  { %1048 = vmatpush3.bf16.msra.mxu1 %v1045_v4  ;;  %v1041_v13 = vpack.c.bf16 %v49_v11, %v48_v10  ;;  %vm287_vm1 = vcmp.eq.s32.totalorder %v251_v14, 1  ;;  %vm253_vm2 = vcmp.eq.s32.totalorder %v251_v14, 0  ;;  %vm288_vm3 = vcmp.eq.s32.totalorder %v252_v15, 1  ;;  %v1234_v18 = vld [vmem:[%s1387_s0 + $0x8] sm:$0xff]  ;;  %v1239_v19 = vld [vmem:[%s1387_s0 + $0x10] sm:$0xff]  ;;  %v1248_v22 = vld [vmem:[%s1387_s0 + $0x18] sm:$0xff] }
  0x18   :  { %1050 = vmatprep.subr.bf16.mxu1 %v1049_v7  ;;  %1038 = vmatprep.subr.bf16.mxu0 %v1037_v12  ;;  %v289_v16 = vsel %vm287_vm1, 1, %v1130_v0  ;;  %v255_v17 = vsel %vm253_vm2, 1, %v1130_v0  ;;  %vm254_vm4 = vcmp.eq.s32.totalorder %v252_v15, 0  ;;  %v290_v20 = vsel %vm288_vm3, 1, %v1130_v0  ;;  %v923_v33 = vld [vmem:[%s1392_s5] ss:$0 sm:$0xff] }
  0x19   :  { %1040 = vmatpush3.bf16.msra.mxu0 %v1037_v12  ;;  %292 = vperm.xlu1 %1064, %v289_v16   ;;  %v256_v21 = vsel %vm254_vm4, 1, %v1130_v0  ;;  %vm322_vm5 = vcmp.eq.s32.totalorder %v252_v15, 2  ;;  %vm321_vm6 = vcmp.eq.s32.totalorder %v251_v14, 2  ;;  %vm356_vm7 = vcmp.eq.s32.totalorder %v252_v15, 3  ;;  %v1279_v45 = vld [vmem:[#allocation2] ss:$0 sm:$0xff] }
  0x1a   :  { %1042 = vmatprep.subr.bf16.mxu0 %v1041_v13  ;;  %258 = vperm.xlu0 %1063, %v255_v17   ;;  %v324_v23 = vsel %vm322_vm5, 1, %v1130_v0  ;;  %v323_v24 = vsel %vm321_vm6, 1, %v1130_v0  ;;  %vm355_vm8 = vcmp.eq.s32.totalorder %v251_v14, 3  ;;  %v358_v25 = vsel %vm356_vm7, 1, %v1130_v0  ;;  %s1131_s5 = smov 112  }
  0x1b   :  { %1052 = vmatpush3.bf16.msra.mxu1 %v1049_v7  ;;  %v357_v26 = vsel %vm355_vm8, 1, %v1130_v0  ;;  %vm398_vm2 = vcmask 130048   ;;  %vm389_vm3 = vcmask 1040384   ;;  %vm392_vm4 = vcmask 1041408  }
  0x1c   :  { %vm395_vm5 = vcmask 1042432   ;;  %vm567_vm6 = vcmask 31744   ;;  %vm620_vm7 = vcmask 1043456  }
  0x1d   :  { %1044 = vmatpush3.bf16.msra.mxu0 %v1041_v13  ;;  %295 = vperm.xlu1 %1064, %v290_v20  }
  0x1e   :  { %1002 = vmatmul.mubr.msk.f32.vlgmr.msra.gmra.mrb[0].mxu1 %vm57_vm0, %v1234_v18  ;;  %261 = vperm.xlu0 %1063, %v256_v21  }
  0x1f   :  { %1004 = vmatprep.mubr.msk.f32.mxu1 %vm57_vm0, %v1239_v19 }
  0x20   :  { %988 = vmatmul.mubr.msk.f32.vlgmr.msra.gmra.mrb[0].mxu0 %vm57_vm0, %v1234_v18 }
  0x21   :  { %990 = vmatprep.mubr.msk.f32.mxu0 %vm57_vm0, %v1239_v19  ;;  %329 = vperm.xlu1 %1064, %v324_v23  }
  0x22   :  { %1005 = vmatmul.mubr.msk.f32.gmra.mrb[2].mxu1 %vm57_vm0, %v1248_v22  ;;  %326 = vperm.xlu0 %1063, %v323_v24  }
  0x24   :  { %991 = vmatmul.mubr.msk.f32.gmra.mrb[2].mxu0 %vm57_vm0, %v1248_v22 }
  0x25   :  { %363 = vperm.xlu1 %1064, %v358_v25  }
  0x26   :  { %360 = vperm.xlu0 %1063, %v357_v26  }
  0x98   :  { %v1258_v27 = vpop.permute.xlu1 %292 }
  0x99   :  { %v1260_v28 = vpop.permute.xlu0 %258  ;;  %vm297_vm9 = vcmp.eq.s32.totalorder %v1258_v27, 1 }
  0x9a   :  { %vm263_vm10 = vcmp.eq.s32.totalorder %v1260_v28, 1 }
  0x9c   :  { %v296_v29 = vpop.permute.xlu1 %295 }
  0x9d   :  { %v262_v30 = vpop.permute.xlu0 %261  ;;  %vm298_vm11 = vcmp.eq.s32.totalorder %v296_v29, 1 }
  0x9e   :  { %vm264_vm12 = vcmp.eq.s32.totalorder %v262_v30, 1 }
  0xa0   :  { %v330_v31 = vpop.permute.xlu1 %329 }
  0xa1   :  { %v1262_v32 = vpop.permute.xlu0 %326  ;;  %vm332_vm13 = vcmp.eq.s32.totalorder %v330_v31, 1 }
  0xa2   :  { %vm331_vm14 = vcmp.eq.s32.totalorder %v1262_v32, 1 }
  0xa4   :  { %v364_v34 = vpop.permute.xlu1 %363 }
  0xa5   :  { %v1267_v35 = vpop.permute.xlu0 %360  ;;  %vm366_vm15 = vcmp.eq.s32.totalorder %v364_v34, 1 }
  0xa6   :  { %vm365_vm1 = vcmp.eq.s32.totalorder %v1267_v35, 1 }
  0xf1   :  { %v1003_v36 = vpop.f32.mrb[0].mxu1 }
  0xf2   :  { %v238_v37 = vadd.f32 %v1003_v36, %v923_v33  ;;  %v232_v38 = vpop.f32.mrb[1].mxu1 }
  0xf3   :  { %v233_v39 = vadd.f32 %v923_v33, %v232_v38  ;;  %v1277_v44 = vpop.f32.mrb[0].mxu0 }
  0xf4   :  { %v266_v40 = vsel %vm264_vm12, %v238_v37, -inf  ;;  %v300_v41 = vsel %vm298_vm11, %v238_v37, -inf  ;;  %v334_v42 = vsel %vm332_vm13, %v238_v37, -inf  ;;  %v368_v43 = vsel %vm366_vm15, %v238_v37, -inf  ;;  %v136_v51 = vpop.f32.mrb[1].mxu0 }
  0xf5   :  { %v270_v46 = vsel %vm57_vm0, %v266_v40, -inf  ;;  %v304_v47 = vsel %vm57_vm0, %v300_v41, -inf  ;;  %v338_v48 = vsel %vm57_vm0, %v334_v42, -inf  ;;  %v372_v49 = vsel %vm57_vm0, %v368_v43, -inf  ;;  %v1006_v50 = vpop.f32.mrb[2].mxu1 }
  0xf6   :  { %v265_v52 = vsel %vm263_vm10, %v233_v39, -inf  ;;  %v299_v53 = vsel %vm297_vm9, %v233_v39, -inf  ;;  %v333_v54 = vsel %vm331_vm14, %v233_v39, -inf  ;;  %v367_v55 = vsel %vm365_vm1, %v233_v39, -inf  ;;  %v242_v56 = vpop.f32.mrb[3].mxu1 }
  0xf7   :  { %v269_v57 = vsel %vm57_vm0, %v265_v52, -inf  ;;  %v303_v58 = vsel %vm57_vm0, %v299_v53, -inf  ;;  %v337_v59 = vsel %vm57_vm0, %v333_v54, -inf  ;;  %v371_v60 = vsel %vm57_vm0, %v367_v55, -inf  ;;  %v1297_v1 = vpop.f32.mrb[2].mxu0 }
  0xf8   :  { %v271_v61 = vmax.f32 %v269_v57, %v270_v46  ;;  %v305_v62 = vmax.f32 %v303_v58, %v304_v47  ;;  %v339_v63 = vmax.f32 %v337_v59, %v338_v48  ;;  %v373_v0 = vmax.f32 %v371_v60, %v372_v49  ;;  %v1300_v5 = vpop.f32.mrb[3].mxu0 }
  0xf9   :  { %v248_v2 = vadd.f32 %v1006_v50, %v923_v33  ;;  %v243_v3 = vadd.f32 %v923_v33, %v242_v56  ;;  %v137_v4 = vadd.f32 %v1279_v45, %v136_v51 }
  0xfa   :  { %v272_v7 = vrot.slane %v271_v61, 4  ;;  %v306_v8 = vrot.slane %v305_v62, 4  ;;  %v340_v9 = vrot.slane %v339_v63, 4  ;;  %v374_v10 = vrot.slane %v373_v0, 4 }
  0xfb   :  { %v268_v11 = vsel %vm264_vm12, %v248_v2, -inf  ;;  %v302_v12 = vsel %vm298_vm11, %v248_v2, -inf  ;;  %v336_v13 = vsel %vm332_vm13, %v248_v2, -inf  ;;  %v370_v14 = vsel %vm366_vm15, %v248_v2, -inf  ;;  %1009 = vmatprep.mubr.msk.f32.mxu1 %vm398_vm2, %v137_v4 }
  0xfc   :  { %v273_v15 = vmax.f32 %v271_v61, %v272_v7  ;;  %v307_v16 = vmax.f32 %v305_v62, %v306_v8  ;;  %v341_v17 = vmax.f32 %v339_v63, %v340_v9  ;;  %v279_v20 = vsel %vm57_vm0, %v268_v11, -inf }
  0xfd   :  { %v313_v21 = vsel %vm57_vm0, %v302_v12, -inf  ;;  %v347_v23 = vsel %vm57_vm0, %v336_v13, -inf  ;;  %v381_v24 = vsel %vm57_vm0, %v370_v14, -inf  ;;  %v267_v25 = vsel %vm263_vm10, %v243_v3, -inf }
  0xfe   :  { %v274_v26 = vrot.slane %v273_v15, 2  ;;  %v308_v29 = vrot.slane %v307_v16, 2  ;;  %v278_v30 = vsel %vm57_vm0, %v267_v25, -inf  ;;  %v301_v31 = vsel %vm297_vm9, %v243_v3, -inf }
  0xff   :  { %v280_v33 = vmax.f32 %v278_v30, %v279_v20  ;;  %v312_v34 = vsel %vm57_vm0, %v301_v31, -inf  ;;  %v335_v36 = vsel %vm331_vm14, %v243_v3, -inf  ;;  %v369_v37 = vsel %vm365_vm1, %v243_v3, -inf }
 0x100   :  { %v314_v38 = vmax.f32 %v312_v34, %v313_v21  ;;  %v346_v28 = vsel %vm57_vm0, %v335_v36, -inf  ;;  %v380_v39 = vsel %vm57_vm0, %v369_v37, -inf  ;;  %v275_v40 = vmax.f32 %v273_v15, %v274_v26 }
 0x101   :  { %v281_v41 = vrot.slane %v280_v33, 4  ;;  %v348_v42 = vmax.f32 %v346_v28, %v347_v23  ;;  %v382_v43 = vmax.f32 %v380_v39, %v381_v24  ;;  %v309_v27 = vmax.f32 %v307_v16, %v308_v29 }
 0x102   :  { %v315_v46 = vrot.slane %v314_v38, 4  ;;  %v276_v47 = vrot.slane %v275_v40, 1  ;;  %v342_v48 = vrot.slane %v341_v17, 2  ;;  %v375_v49 = vmax.f32 %v373_v0, %v374_v10 }
 0x103   :  { %v282_v50 = vmax.f32 %v280_v33, %v281_v41  ;;  %v349_v32 = vrot.slane %v348_v42, 4  ;;  %v383_v51 = vrot.slane %v382_v43, 4  ;;  %v310_v52 = vrot.slane %v309_v27, 1 }
 0x104   :  { %v316_v35 = vmax.f32 %v314_v38, %v315_v46  ;;  %v277_v53 = vmax.f32 %v275_v40, %v276_v47  ;;  %v343_v54 = vmax.f32 %v341_v17, %v342_v48  ;;  %v376_v55 = vrot.slane %v375_v49, 2 }
 0x105   :  { %v283_v56 = vrot.slane %v282_v50, 2  ;;  %v350_v57 = vmax.f32 %v348_v42, %v349_v32  ;;  %v311_v58 = vmax.f32 %v309_v27, %v310_v52  ;;  %v384_v0 = vmax.f32 %v382_v43, %v383_v51 }
 0x106   :  { %v317_v59 = vrot.slane %v316_v35, 2  ;;  %v344_v60 = vrot.slane %v343_v54, 1  ;;  %v377_v61 = vmax.f32 %v375_v49, %v376_v55  ;;  %v147_v24 = vadd.f32 %v1279_v45, %v1300_v5 }
 0x107   :  { %v390_v62 = vsel %vm389_vm3, %v277_v53, %v311_v58  ;;  %v284_v63 = vmax.f32 %v282_v50, %v283_v56  ;;  %v351_v2 = vrot.slane %v350_v57, 2  ;;  %v385_v10 = vrot.slane %v384_v0, 2 }
 0x108   :  { %v345_v3 = vmax.f32 %v343_v54, %v344_v60  ;;  %v378_v4 = vrot.slane %v377_v61, 1  ;;  %v318_v7 = vmax.f32 %v316_v35, %v317_v59  ;;  %v142_v26 = vadd.f32 %v1277_v44, %v1279_v45  ;;  %v783_v60 = vld [vmem:[%s1393_s6] sm:$0xff] }
 0x109   :  { %v285_v8 = vrot.slane %v284_v63, 1  ;;  %v352_v9 = vmax.f32 %v350_v57, %v351_v2  ;;  %v386_v16 = vmax.f32 %v384_v0, %v385_v10  ;;  %v152_v5 = vadd.f32 %v1297_v1, %v1279_v45 }
 0x10a   :  { %v379_v11 = vmax.f32 %v377_v61, %v378_v4  ;;  %v393_v12 = vsel %vm392_vm4, %v390_v62, %v345_v3  ;;  %v319_v13 = vrot.slane %v318_v7, 1  ;;  %v784_v61 = vld [vmem:[%s1393_s6 + $0x8] sm:$0xff] }
 0x10b   :  { %v286_v14 = vmax.f32 %v284_v63, %v285_v8  ;;  %v353_v15 = vrot.slane %v352_v9, 1  ;;  %v387_v23 = vrot.slane %v386_v16, 1  ;;  %v1053_v62 = vpack.c.bf16 %v784_v61, %v783_v60 }
 0x10c   :  { %v396_v17 = vsel %vm395_vm5, %v393_v12, %v379_v11  ;;  %v320_v20 = vmax.f32 %v318_v7, %v319_v13 }
 0x10d   :  { %1007 = vmatprep.subr.msk.mxu1 %vm398_vm2, %v396_v17  ;;  %v354_v21 = vmax.f32 %v352_v9, %v353_v15  ;;  %v388_v29 = vmax.f32 %v386_v16, %v387_v23 }
 0x10e   :  { %1008 = vmatpush3.xpose.msk.msra.mxu1 %vm398_vm2, %v396_v17  ;;  %v391_v25 = vsel %vm389_vm3, %v286_v14, %v320_v20 }
 0x10f   :  { %v394_v30 = vsel %vm392_vm4, %v391_v25, %v354_v21 }
 0x110   :  { %v397_v31 = vsel %vm395_vm5, %v394_v30, %v388_v29 }
 0x111   :  { %1010 = vmatmul.mubr.msk.f32.vlgmr.msra.gmra.mrb[4].mxu1 %vm398_vm2, %v142_v26  ;;  %1012 = vmatprep.subr.msk.mxu1 %vm398_vm2, %v397_v31 }
 0x112   :  { %1014 = vmatprep.mubr.msk.f32.mxu1 %vm398_vm2, %v147_v24  ;;  %1013 = vmatpush3.xpose.msk.msra.mxu1 %vm398_vm2, %v397_v31 }
 0x115   :  { %1015 = vmatmul.mubr.msk.f32.vlgmr.msra.gmra.mrb[6].mxu1 %vm398_vm2, %v152_v5 }
 0x1e4   :  { %v1011_v44 = vpop.f32.mrb[4].mxu1 }
 0x1e5   :  { %v474_v33 = vpop.f32.mrb[5].mxu1  ;;  %v571_v34 = vsel %vm567_vm6, %v1011_v44, -inf }
 0x1e6   :  { %572 = vmax.xlane.f32.xlu1 %v571_v34  ;;  %v568_v36 = vsel %vm567_vm6, %v474_v33, -inf }
 0x1e7   :  { %569 = vmax.xlane.f32.xlu0 %v568_v36 }
 0x1e8   :  { %v1016_v37 = vpop.f32.mrb[6].mxu1 }
 0x1e9   :  { %v558_v38 = vpop.f32.mrb[7].mxu1  ;;  %v577_v39 = vsel %vm567_vm6, %v1016_v37, -inf }
 0x1ea   :  { %v574_v28 = vsel %vm567_vm6, %v558_v38, -inf }
 0x1eb   :  { %575 = vmax.xlane.f32.xlu0 %v574_v28 }
 0x1ef   :  { %578 = vmax.xlane.f32.xlu0 %v577_v39 }
 0x273   :  { %v573_v45 = vpop.xlane.xlu1 %572 }
 0x274   :  { %v581_v1 = vsub.f32 %v1011_v44, %v573_v45  ;;  %v570_v40 = vpop.xlane.xlu0 %569 }
 0x275   :  { %v580_v41 = vsub.f32 %v474_v33, %v570_v40 }
 0x276   :  { %v586_v42 = vmul.f32 1.442695, %v581_v1 }
 0x277   :  { %v584_v43 = vmul.f32 1.442695, %v580_v41 }
 0x278   :  { %1065 = vpow2.f32 %v586_v42  ;;  %v576_v27 = vpop.xlane.xlu0 %575 }
 0x279   :  { %1067 = vpow2.f32 %v584_v43  ;;  %v582_v46 = vsub.f32 %v558_v38, %v576_v27 }
 0x27b   :  { %v588_v47 = vmul.f32 1.442695, %v582_v46 }
 0x27c   :  { %v579_v48 = vpop.xlane.xlu0 %578 }
 0x27d   :  { %1069 = vpow2.f32 %v588_v47  ;;  %v583_v49 = vsub.f32 %v1016_v37, %v579_v48 }
 0x27f   :  { %v590_v50 = vmul.f32 1.442695, %v583_v49 }
 0x281   :  { %1071 = vpow2.f32 %v590_v50 }
 0x282   :  { %v1066_v32 = vpop.eup %1065 }
 0x283   :  { %v1068_v51 = vpop.eup %1067  ;;  %v595_v52 = vsel %vm567_vm6, %v1066_v32, 0.0 }
 0x284   :  { %596 = vadd.xlane.f32.xlu0 %v595_v52  ;;  %v592_v35 = vsel %vm567_vm6, %v1068_v51, 0.0 }
 0x285   :  { %593 = vadd.xlane.f32.xlu1 %v592_v35 }
 0x287   :  { %v1070_v53 = vpop.eup %1069 }
 0x288   :  { %v598_v54 = vsel %vm567_vm6, %v1070_v53, 0.0 }
 0x289   :  { %599 = vadd.xlane.f32.xlu1 %v598_v54 }
 0x28b   :  { %v1072_v55 = vpop.eup %1071 }
 0x28c   :  { %v601_v56 = vsel %vm567_vm6, %v1072_v55, 0.0 }
 0x28d   :  { %602 = vadd.xlane.f32.xlu0 %v601_v56 }
 0x29a   :  { %612 = vrot.lane.b32.xlu1 %v396_v17, %s1131_s5  ;;  %v940_v17 = vld [vmem:[%s1394_s7] ss:$0 sm:$0xff]  ;;  %s1103_s7 = scalar_lea.vmem %s907_s26, 512 }
 0x29b   :  { %p1104_p8 = scmp.ne.s32.totalorder %s907_s26, %s1103_s7  ;;  %p1109_p10 = scmp.lt.s32.totalorder %s1103_s7, %s1103_s7 }
 0x29d   :  { %p1110_p11 = por %p1109_p10, %p1108_p9 }
 0x29f   :  { %p1111_p12 = pnand %p1110_p11, %p1104_p8 }
 0x2a3   :  { %698 = vrot.lane.b32.xlu0 %v397_v31, %s1131_s5 }
 0x311   :  { %v597_v57 = vpop.xlane.xlu0 %596 }
 0x312   :  { %1073 = vrcp.f32 %v597_v57  ;;  %v594_v58 = vpop.xlane.xlu1 %593 }
 0x313   :  { %1075 = vrcp.f32 %v594_v58 }
 0x316   :  { %v600_v59 = vpop.xlane.xlu1 %599 }
 0x317   :  { %1077 = vrcp.f32 %v600_v59 }
 0x31a   :  { %v613_v63 = vpop.permute.xlu1 %612  ;;  %v603_v2 = vpop.xlane.xlu0 %602 }
 0x31b   :  { %1079 = vrcp.f32 %v603_v2  ;;  %1017 = vmatprep.subr.msk.mxu0 %vm620_vm7, %v613_v63 }
 0x31c   :  { %v1074_v0 = vpop.eup %1073  ;;  %1018 = vmatpush3.msk.msra.mxu0 %vm620_vm7, %v613_v63 }
 0x31d   :  { %v1076_v3 = vpop.eup %1075  ;;  %1054 = vmatprep.subr.bf16.mxu0 %v1053_v62  ;;  %v607_v7 = vmul.f32 %v1074_v0, %v1066_v32 }
 0x31e   :  { %v605_v4 = vmul.f32 %v1076_v3, %v1068_v51  ;;  %v699_v8 = vpop.permute.xlu0 %698 }
 0x31f   :  { %1022 = vmatprep.subr.msk.mxu1 %vm620_vm7, %v699_v8 }
 0x320   :  { %1019 = vmatprep.mubr.msk.f32.mxu0 %vm567_vm6, %v605_v4  ;;  %1023 = vmatpush3.msk.msra.mxu1 %vm620_vm7, %v699_v8 }
 0x321   :  { %1020 = vmatmul.mubr.msk.f32.vlgmr.msra.gmra.mrb[4].mxu0 %vm567_vm6, %v607_v7  ;;  %v1078_v9 = vpop.eup %1077 }
 0x322   :  { %1056 = vmatpush3.bf16.msra.mxu0 %v1053_v62  ;;  %v609_v10 = vmul.f32 %v1078_v9, %v1070_v53 }
 0x324   :  { %1024 = vmatprep.mubr.msk.f32.mxu1 %vm567_vm6, %v609_v10 }
 0x325   :  { %v1080_v11 = vpop.eup %1079 }
 0x326   :  { %v611_v12 = vmul.f32 %v1080_v11, %v1072_v55 }
 0x328   :  { %1025 = vmatmul.mubr.msk.f32.vlgmr.msra.gmra.mrb[8].mxu1 %vm567_vm6, %v611_v12 }
 0x3f4   :  { %v1021_v13 = vpop.f32.mrb[4].mxu0 }
 0x3f5   :  { %v689_v14 = vpop.f32.mrb[5].mxu0 }
 0x3f6   :  { %1031 = vmatprep.mubr.msk.f32.mxu0 %vm398_vm2, %v689_v14 }
 0x3f7   :  { %1032 = vmatmul.mubr.msk.f32.vlgmr.msra.gmra.mrb[6].mxu0 %vm398_vm2, %v1021_v13 }
 0x3fb   :  { %v1026_v15 = vpop.f32.mrb[8].mxu1 }
 0x3fc   :  { %v774_v16 = vpop.f32.mrb[9].mxu1 }
 0x3fd   :  { %1034 = vmatprep.mubr.msk.f32.mxu0 %vm398_vm2, %v774_v16 }
 0x3fe   :  { %1035 = vmatmul.mubr.msk.f32.gmra.mrb[8].mxu0 %vm398_vm2, %v1026_v15 }
 0x4ca   :  { %v1033_v20 = vpop.f32.mrb[6].mxu0 }
 0x4cb   :  { %v876_v21 = vadd.f32 %v1033_v20, %v940_v17  ;;  %v870_v23 = vpop.f32.mrb[7].mxu0 }
 0x4cc   :  { %v871_v24 = vadd.f32 %v940_v17, %v870_v23 }
 0x4cd   :  { %v894_v25 = vadd.f32 %v876_v21, %v1234_v18 }
 0x4ce   :  { %v893_v26 = vadd.f32 %v871_v24, %v1207_v6 }
 0x4cf   :  { %898 = vst.msk [vmem:[#allocation5 + $0x8] sm:$0xff] %vm57_vm0, %v894_v25 }
 0x4d0   :  { %897 = vst.msk [vmem:[#allocation5] sm:$0xff] %vm57_vm0, %v893_v26 }
 0x4d1   :  { %v1036_v29 = vpop.f32.mrb[8].mxu0 }
 0x4d2   :  { %v886_v30 = vadd.f32 %v1036_v29, %v940_v17  ;;  %v880_v31 = vpop.f32.mrb[9].mxu0 }
 0x4d3   :  { %v881_v5 = vadd.f32 %v940_v17, %v880_v31 }
 0x4d4   :  { %v896_v44 = vadd.f32 %v886_v30, %v1248_v22 }
 0x4d5   :  { %v895_v33 = vadd.f32 %v881_v5, %v1239_v19 }
 0x4d6   :  { %900 = vst.msk [vmem:[#allocation5 + $0x18] sm:$0xff] %vm57_vm0, %v896_v44 }
 0x4d7   :  { %899 = vst.msk [vmem:[#allocation5 + $0x10] sm:$0xff] %vm57_vm0, %v895_v33 }
 0x4d8   :  { %1114 = shalt.err (!%p1111_p12)
}
 0x4d9   :  { %s1115_s29 = scalar_lea.hbm %s1395_s8, 512 }
 0x4da   :  { %p1116_p13 = scmp.ne.s32.totalorder %s1395_s8, %s1115_s29  ;;  %p1119_p0 = scmp.lt.u32.totalorder %s1115_s29, %s1395_s8 }
 0x4dc   :  { %p1121_p1 = pnand %p1119_p0, %p1116_p13 }
 0x4de   :  { %1124 = shalt.err (!%p1121_p1)
}
 0x4df   :  { %s1133_s11 = smov 128   ;;  %s1134_s12 = smov 8  }
 0x4e0   :  { %912 = dma.vmem_to_hbm [thread:$0]  %s907_s26, 512, %s1395_s8, [#allocation4], %s1133_s11, %s1133_s11, %s1134_s12  }
 0x4e1   :  { %1127 = dma.done.wait [#allocation4], 512  }
 0x4e2   :  { %1128 = vsyncadd [#allocation4], 4294966784 }
 0x4e3   :  { %916 = vsyncpa [#allocation3], 1 }
 0x4e4   :  { %917 = vsyncpa [#allocation4], 1 }

</bundles_post_ra>
